<compile_context>
chip_gen: v5e
topology: v5e:2x2
jax: 0.10.0
libtpu: 0.0.40
codegen_flags: <defaults>
</compile_context>

<pallas_src>
import jax
import jax.numpy as jnp
from jax import lax
from jax.experimental import pallas as pl
from jax.experimental.pallas import tpu as pltpu


def _elu(v):
    # F.elu with alpha=1.0 (exp(v)-1 on the negative branch; the select discards
    # the positive-branch exp so there is no NaN risk).
    return jnp.where(v > 0, v, jnp.exp(v) - 1.0)


def _make_kernel(N, Fin, H1, H2, lane_label, offs):
    """Build the per-graph kernel body; shape ints and slab row offsets are static."""
    o_w1, o_wf, o_lw1, o_lw2, o_lw3 = offs
    f32, bf16 = jnp.float32, jnp.bfloat16

    def kernel(x_ref, adj_ref, w_ref, bias_ref, adjrec_ref, slab_ref):
        x = x_ref[...]                        # [N, Fin] bf16
        adj = adj_ref[...]                    # [N, N]   bf16

        # Static views into the packed weight slab (row offsets 16-aligned for bf16).
        w1 = w_ref[o_w1:o_w1 + Fin, 0:H1]                 # gc1 weight          [Fin, H1]
        wf = w_ref[o_wf:o_wf + H1, 0:3 * H2]              # [W2 | W3 | W2 @ C]  [H1, 3*H2]
        lw1 = w_ref[o_lw1:o_lw1 + H2, 0:32]               # label_net.0         [H2, 32]
        lw2 = w_ref[o_lw2:o_lw2 + 32, 0:64]               # label_net.2         [32, 64]
        lw3 = w_ref[o_lw3:o_lw3 + 64, 0:lane_label]       # label_net.4 (lane-padded)

        # gc1: h1 = relu(adj @ (x @ W1))
        s1 = jnp.dot(x, w1, preferred_element_type=f32)
        h1 = jnp.maximum(
            jnp.dot(adj, s1.astype(bf16), preferred_element_type=f32), 0.0)   # [N, H1]

        # gc2 + gc3 + causal layer fused:
        #   [mu | logvar | z] = adj @ (h1 @ [W2 | W3 | W2 @ C])
        s = jnp.dot(h1.astype(bf16), wf, preferred_element_type=f32)          # [N, 3*H2]
        mlz = jnp.dot(adj, s.astype(bf16), preferred_element_type=f32)        # [N, 3*H2]
        z = mlz[:, 2 * H2:3 * H2]                                             # [N, H2]
        zb = z.astype(bf16)

        # label_net: Linear(H2,32)+ELU -> Linear(32,64)+ELU -> Linear(64,Fin)
        b = bias_ref[...]                                                     # [1, 96+lane_label] f32
        a1 = _elu(jnp.dot(zb, lw1, preferred_element_type=f32) + b[:, 0:32])
        a2 = _elu(jnp.dot(a1.astype(bf16), lw2, preferred_element_type=f32) + b[:, 32:96])
        label = (jnp.dot(a2.astype(bf16), lw3, preferred_element_type=f32)
                 + b[:, 96:96 + lane_label])                                  # [N, lane_label]

        # InnerProductDecoder (act=identity, eval dropout=identity): z @ z.T,
        # contracting the last dims of both operands (no transpose copy in VMEM).
        adjrec_ref[...] = lax.dot_general(
            zb, zb, dimension_numbers=(((1,), (1,)), ((), ())),
            preferred_element_type=f32)                                       # [N, N]

        # Lane-dense packed slab (width = multiple of 128): [mu | logvar | z | label | 0].
        # The zero pad lanes come from the lane-padded lw3 / lb3 (zero columns),
        # so no explicit jnp.zeros / extra concat operand is needed.
        slab_ref[...] = jnp.concatenate([mlz, label], axis=-1)

    return kernel


def _pack_rows(mats, lanes, row_align=16):
    """Row-stack 2-D f32 matrices into one [R, lanes] zero-padded slab; each
    block's row offset is aligned to `row_align` (bf16 sublane packing)."""
    blocks, offsets, r = [], [], 0
    for m in mats:
        rows, cols = m.shape
        rpad = (-rows) % row_align
        blocks.append(jnp.pad(m, ((0, rpad), (0, lanes - cols))))
        offsets.append(r)
        r += rows + rpad
    return jnp.concatenate(blocks, axis=0), tuple(offsets)


def gcn_model_vae_forward(x, adj, params):
    """Eval-mode GCNModelVAE forward as one pallas_call.

    Accepts a single graph (x: [N, Fin], adj: [N, N]) or a batch of graphs
    (x: [B, N, Fin], adj: [B, N, N]); the batch maps to a "parallel" grid axis
    with the packed weights resident across it.

    TODO(synk): the per-graph all-resident block is fine at toy n_nodes; before
    scaling N (esp. v7x: 64 MiB VMEM, 32 MiB default scoped limit) adj / adj_rec
    must be row-tiled with an explicit vmem_limit_bytes budget, and on v6e/v7x
    the weight-side dots should row-stack several graphs per grid step to fill
    the 256-wide MXU.
    """
    single = (x.ndim == 2)
    if single:
        x, adj = x[None], adj[None]
    B, N, Fin = x.shape
    H1 = params["w1"].shape[1]
    H2 = params["w2"].shape[1]
    f32, bf16 = jnp.float32, jnp.bfloat16

    # ---- wrapper-side layout plumbing (one-time, outside the kernel) ----------
    # Fold the causal map C into the fused gc2/gc3 weight (fold computed in f32):
    #   z = (adj @ (h1 @ W2)) @ C == adj @ (h1 @ (W2 @ C))
    w_fused = jnp.concatenate(
        [params["w2"], params["w3"], params["w2"] @ params["c"]], axis=1)     # [H1, 3*H2]

    slab_w = ((3 * H2 + Fin + 127) // 128) * 128        # lane-dense packed output width
    lane_label = slab_w - 3 * H2                        # label occupies the remaining lanes
    lw3_pad = jnp.pad(params["lw3"], ((0, 0), (0, lane_label - Fin)))         # [64, lane_label]
    lb3_pad = jnp.pad(params["lb3"], ((0, 0), (0, lane_label - Fin)))

    lanes = max(H1, 3 * H2, 32, 64, lane_label)
    wslab_f32, offs = _pack_rows(
        [params["w1"], w_fused, params["lw1"], params["lw2"], lw3_pad], lanes)
    wslab = wslab_f32.astype(bf16)                                            # one bf16 weight slab
    biases = jnp.concatenate(
        [params["lb1"], params["lb2"], lb3_pad], axis=1).astype(f32)          # [1, 96+lane_label]

    xb = x.astype(bf16)
    adjb = adj.astype(bf16)

    kernel = _make_kernel(N, Fin, H1, H2, lane_label, offs)

    in_specs = [
        pl.BlockSpec((None, N, Fin), lambda b: (b, 0, 0)),     # per-graph features
        pl.BlockSpec((None, N, N), lambda b: (b, 0, 0)),       # per-graph adjacency
        pl.BlockSpec(wslab.shape, lambda b: (0, 0)),           # weights: resident across grid
        pl.BlockSpec(biases.shape, lambda b: (0, 0)),          # biases:  resident across grid
    ]
    out_specs = (
        pl.BlockSpec((None, N, N), lambda b: (b, 0, 0)),       # adj_rec
        pl.BlockSpec((None, N, slab_w), lambda b: (b, 0, 0)),  # [mu|logvar|z|label|pad]
    )
    out_shape = (
        jax.ShapeDtypeStruct((B, N, N), f32),
        jax.ShapeDtypeStruct((B, N, slab_w), f32),
    )

    flops = 2 * B * N * (Fin * H1 + N * H1 + H1 * 3 * H2 + N * 3 * H2
                         + H2 * 32 + 32 * 64 + 64 * lane_label + N * H2)
    bytes_accessed = (2 * B * N * (Fin + N)                 # bf16 x, adj
                      + 2 * int(wslab.size) + 4 * int(biases.size)
                      + 4 * B * N * (N + slab_w))           # f32 outputs
    cost = pl.CostEstimate(flops=flops, transcendentals=B * N * (32 + 64),
                           bytes_accessed=bytes_accessed)

    adj_rec, slab = pl.pallas_call(
        kernel,
        out_shape=out_shape,
        grid=(B,),
        in_specs=in_specs,
        out_specs=out_specs,
        compiler_params=pltpu.CompilerParams(dimension_semantics=("parallel",)),
        cost_estimate=cost,
    )(xb, adjb, wslab, biases)

    # Unpack the slab with cheap XLA slices (outside the kernel).
    mu = slab[..., 0:H2]
    logvar = slab[..., H2:2 * H2]
    z = slab[..., 2 * H2:3 * H2]
    label = slab[..., 3 * H2:3 * H2 + Fin]
    z1 = mu    # eval-mode reparameterize: z1 == mu (no duplicate kernel writeback)

    outs = (label, adj_rec, mu, logvar, z1, z)
    if single:
        outs = tuple(o[0] for o in outs)
    return outs


if __name__ == "__main__":
    # Shapes implied by the module: input_feat_dim=32, n_nodes=64,
    # hidden_dim1=32, hidden_dim2=16.  B=2 graphs exercise the parallel grid axis.
    B, N, Fin, H1, H2 = 2, 64, 32, 32, 16

    key = jax.random.PRNGKey(0)
    ks = jax.random.split(key, 12)

    x = jax.random.normal(ks[0], (B, N, Fin), jnp.float32)

    # Dense symmetric adjacencies with self-loops, row-normalized.
    a = jax.random.uniform(ks[1], (B, N, N), jnp.float32)
    adj = ((a + jnp.swapaxes(a, -1, -2)) > 1.2).astype(jnp.float32)
    adj = adj + jnp.eye(N, dtype=jnp.float32)[None]
    adj = adj / jnp.sum(adj, axis=-1, keepdims=True)

    # Deterministic synthetic parameters (PyTorch Linear weights stored
    # pre-transposed as [in, out] so the kernel computes x @ W + b).
    params = dict(
        w1=0.1 * jax.random.normal(ks[2], (Fin, H1), jnp.float32),
        w2=0.1 * jax.random.normal(ks[3], (H1, H2), jnp.float32),
        w3=0.1 * jax.random.normal(ks[4], (H1, H2), jnp.float32),
        c=0.1 * jax.random.normal(ks[5], (H2, H2), jnp.float32),
        lw1=0.1 * jax.random.normal(ks[6], (H2, 32), jnp.float32),
        lb1=0.01 * jax.random.normal(ks[7], (1, 32), jnp.float32),
        lw2=0.1 * jax.random.normal(ks[8], (32, 64), jnp.float32),
        lb2=0.01 * jax.random.normal(ks[9], (1, 64), jnp.float32),
        lw3=0.1 * jax.random.normal(ks[10], (64, Fin), jnp.float32),
        lb3=0.01 * jax.random.normal(ks[11], (1, Fin), jnp.float32),
    )

    outs = jax.block_until_ready(gcn_model_vae_forward(x, adj, params))

    # Pure-JAX f32 reference of the same eval-mode forward (correctness gate).
    def reference_single(xg, adjg):
        elu = lambda v: jnp.where(v > 0, v, jnp.exp(v) - 1.0)
        h1 = jnp.maximum(adjg @ (xg @ params["w1"]), 0.0)
        mu = adjg @ (h1 @ params["w2"])
        logvar = adjg @ (h1 @ params["w3"])
        z1 = mu
        z = z1 @ params["c"]
        a1 = elu(z @ params["lw1"] + params["lb1"])
        a2 = elu(a1 @ params["lw2"] + params["lb2"])
        label = a2 @ params["lw3"] + params["lb3"]
        adj_rec = z @ z.T
        return (label, adj_rec, mu, logvar, z1, z)

    refs = tuple(jnp.stack(r) for r in
                 zip(*(reference_single(x[b], adj[b]) for b in range(B))))

    # bf16 MXU operands with f32 accumulation -> bf16-appropriate tolerance.
    ok = all(bool(jnp.allclose(o, r, atol=5e-3, rtol=5e-2)) for o, r in zip(outs, refs))
    print("KERNEL_OK" if ok else "MISMATCH")
</pallas_src>

<mosaic_0001>
module attributes {stable_mosaic.version = 11 : i64} {
  func.func @kernel(%arg0: i32, %arg1: memref<1x64x32xbf16, #tpu.memory_space<vmem>>, %arg2: memref<1x64x64xbf16, #tpu.memory_space<vmem>>, %arg3: memref<176x80xbf16, #tpu.memory_space<vmem>>, %arg4: memref<1x176xf32, #tpu.memory_space<vmem>>, %arg5: memref<1x64x64xf32, #tpu.memory_space<vmem>>, %arg6: memref<1x64x128xf32, #tpu.memory_space<vmem>>) attributes {dimension_semantics = [#tpu.dimension_semantics<parallel>], iteration_bounds = array<i64: 2>, scalar_prefetch = 0 : i64, scratch_operands = 0 : i64, tpu.core_type = #tpu.core_type<tc>, window_params = [{transform_indices = @transform_0, window_bounds = array<i64: 1, 64, 32>}, {transform_indices = @transform_1, window_bounds = array<i64: 1, 64, 64>}, {pipeline_mode = #tpu.pipeline_mode<synchronous>, transform_indices = @transform_2, window_bounds = array<i64: 176, 80>}, {pipeline_mode = #tpu.pipeline_mode<synchronous>, transform_indices = @transform_3, window_bounds = array<i64: 1, 176>}, {transform_indices = @transform_4, window_bounds = array<i64: 1, 64, 64>}, {transform_indices = @transform_5, window_bounds = array<i64: 1, 64, 128>}]} {
    %c0 = arith.constant 0 : index
    %c0_0 = arith.constant 0 : index
    %c0_1 = arith.constant 0 : index
    %0 = vector.load %arg1[%c0, %c0_0, %c0_1] : memref<1x64x32xbf16, #tpu.memory_space<vmem>>, vector<1x64x32xbf16>
    %1 = vector.shape_cast %0 : vector<1x64x32xbf16> to vector<64x32xbf16>
    %c0_2 = arith.constant 0 : index
    %c0_3 = arith.constant 0 : index
    %c0_4 = arith.constant 0 : index
    %2 = vector.load %arg2[%c0_2, %c0_3, %c0_4] : memref<1x64x64xbf16, #tpu.memory_space<vmem>>, vector<1x64x64xbf16>
    %3 = vector.shape_cast %2 : vector<1x64x64xbf16> to vector<64x64xbf16>
    %c0_5 = arith.constant 0 : index
    %c0_6 = arith.constant 0 : index
    %4 = vector.load %arg3[%c0_5, %c0_6] : memref<176x80xbf16, #tpu.memory_space<vmem>>, vector<32x32xbf16>
    %c32 = arith.constant 32 : index
    %c0_7 = arith.constant 0 : index
    %5 = vector.load %arg3[%c32, %c0_7] : memref<176x80xbf16, #tpu.memory_space<vmem>>, vector<32x48xbf16>
    %c64 = arith.constant 64 : index
    %c0_8 = arith.constant 0 : index
    %6 = vector.load %arg3[%c64, %c0_8] : memref<176x80xbf16, #tpu.memory_space<vmem>>, vector<16x32xbf16>
    %c80 = arith.constant 80 : index
    %c0_9 = arith.constant 0 : index
    %7 = vector.load %arg3[%c80, %c0_9] : memref<176x80xbf16, #tpu.memory_space<vmem>>, vector<32x64xbf16>
    %c112 = arith.constant 112 : index
    %c0_10 = arith.constant 0 : index
    %8 = vector.load %arg3[%c112, %c0_10] : memref<176x80xbf16, #tpu.memory_space<vmem>>, vector<64x80xbf16>
    %cst = arith.constant dense<0.000000e+00> : vector<64x32xf32>
    %9 = tpu.matmul %1, %4, %cst {dimension_numbers = #tpu.dot_dimension_numbers<[1], [0], [0], [1], [0, 0, 1, 1], [], []>} : vector<64x32xbf16>, vector<32x32xbf16>, vector<64x32xf32> -> vector<64x32xf32>
    %10 = arith.truncf %9 : vector<64x32xf32> to vector<64x32xbf16>
    %cst_11 = arith.constant dense<0.000000e+00> : vector<64x32xf32>
    %11 = tpu.matmul %3, %10, %cst_11 {dimension_numbers = #tpu.dot_dimension_numbers<[1], [0], [0], [1], [0, 0, 1, 1], [], []>} : vector<64x64xbf16>, vector<64x32xbf16>, vector<64x32xf32> -> vector<64x32xf32>
    %cst_12 = arith.constant 0.000000e+00 : f32
    %12 = vector.broadcast %cst_12 : f32 to vector<64x32xf32>
    %13 = arith.maximumf %11, %12 : vector<64x32xf32>
    %14 = arith.truncf %13 : vector<64x32xf32> to vector<64x32xbf16>
    %cst_13 = arith.constant dense<0.000000e+00> : vector<64x48xf32>
    %15 = tpu.matmul %14, %5, %cst_13 {dimension_numbers = #tpu.dot_dimension_numbers<[1], [0], [0], [1], [0, 0, 1, 1], [], []>} : vector<64x32xbf16>, vector<32x48xbf16>, vector<64x48xf32> -> vector<64x48xf32>
    %16 = arith.truncf %15 : vector<64x48xf32> to vector<64x48xbf16>
    %cst_14 = arith.constant dense<0.000000e+00> : vector<64x48xf32>
    %17 = tpu.matmul %3, %16, %cst_14 {dimension_numbers = #tpu.dot_dimension_numbers<[1], [0], [0], [1], [0, 0, 1, 1], [], []>} : vector<64x64xbf16>, vector<64x48xbf16>, vector<64x48xf32> -> vector<64x48xf32>
    %18 = vector.extract_strided_slice %17 {offsets = [0, 32], sizes = [64, 16], strides = [1, 1]} : vector<64x48xf32> to vector<64x16xf32>
    %19 = arith.truncf %18 : vector<64x16xf32> to vector<64x16xbf16>
    %c0_15 = arith.constant 0 : index
    %c0_16 = arith.constant 0 : index
    %20 = vector.load %arg4[%c0_15, %c0_16] : memref<1x176xf32, #tpu.memory_space<vmem>>, vector<1x176xf32>
    %cst_17 = arith.constant dense<0.000000e+00> : vector<64x32xf32>
    %21 = tpu.matmul %19, %6, %cst_17 {dimension_numbers = #tpu.dot_dimension_numbers<[1], [0], [0], [1], [0, 0, 1, 1], [], []>} : vector<64x16xbf16>, vector<16x32xbf16>, vector<64x32xf32> -> vector<64x32xf32>
    %22 = vector.extract_strided_slice %20 {offsets = [0, 0], sizes = [1, 32], strides = [1, 1]} : vector<1x176xf32> to vector<1x32xf32>
    %23 = vector.broadcast %22 : vector<1x32xf32> to vector<64x32xf32>
    %24 = arith.addf %21, %23 : vector<64x32xf32>
    %cst_18 = arith.constant 0.000000e+00 : f32
    %25 = vector.broadcast %cst_18 : f32 to vector<64x32xf32>
    %26 = arith.cmpf ogt, %24, %25 : vector<64x32xf32>
    %27 = math.exp %24 : vector<64x32xf32>
    %cst_19 = arith.constant 1.000000e+00 : f32
    %28 = vector.broadcast %cst_19 : f32 to vector<64x32xf32>
    %29 = arith.subf %27, %28 : vector<64x32xf32>
    %30 = arith.select %26, %24, %29 : vector<64x32xi1>, vector<64x32xf32>
    %31 = arith.truncf %30 : vector<64x32xf32> to vector<64x32xbf16>
    %cst_20 = arith.constant dense<0.000000e+00> : vector<64x64xf32>
    %32 = tpu.matmul %31, %7, %cst_20 {dimension_numbers = #tpu.dot_dimension_numbers<[1], [0], [0], [1], [0, 0, 1, 1], [], []>} : vector<64x32xbf16>, vector<32x64xbf16>, vector<64x64xf32> -> vector<64x64xf32>
    %33 = vector.extract_strided_slice %20 {offsets = [0, 32], sizes = [1, 64], strides = [1, 1]} : vector<1x176xf32> to vector<1x64xf32>
    %34 = vector.broadcast %33 : vector<1x64xf32> to vector<64x64xf32>
    %35 = arith.addf %32, %34 : vector<64x64xf32>
    %cst_21 = arith.constant 0.000000e+00 : f32
    %36 = vector.broadcast %cst_21 : f32 to vector<64x64xf32>
    %37 = arith.cmpf ogt, %35, %36 : vector<64x64xf32>
    %38 = math.exp %35 : vector<64x64xf32>
    %cst_22 = arith.constant 1.000000e+00 : f32
    %39 = vector.broadcast %cst_22 : f32 to vector<64x64xf32>
    %40 = arith.subf %38, %39 : vector<64x64xf32>
    %41 = arith.select %37, %35, %40 : vector<64x64xi1>, vector<64x64xf32>
    %42 = arith.truncf %41 : vector<64x64xf32> to vector<64x64xbf16>
    %cst_23 = arith.constant dense<0.000000e+00> : vector<64x80xf32>
    %43 = tpu.matmul %42, %8, %cst_23 {dimension_numbers = #tpu.dot_dimension_numbers<[1], [0], [0], [1], [0, 0, 1, 1], [], []>} : vector<64x64xbf16>, vector<64x80xbf16>, vector<64x80xf32> -> vector<64x80xf32>
    %44 = vector.extract_strided_slice %20 {offsets = [0, 96], sizes = [1, 80], strides = [1, 1]} : vector<1x176xf32> to vector<1x80xf32>
    %45 = vector.broadcast %44 : vector<1x80xf32> to vector<64x80xf32>
    %46 = arith.addf %43, %45 : vector<64x80xf32>
    %cst_24 = arith.constant dense<0.000000e+00> : vector<64x64xf32>
    %47 = tpu.matmul %19, %19, %cst_24 {dimension_numbers = #tpu.dot_dimension_numbers<[1], [1], [0], [0], [0, 0, 1, 0], [], []>} : vector<64x16xbf16>, vector<64x16xbf16>, vector<64x64xf32> -> vector<64x64xf32>
    %c0_25 = arith.constant 0 : index
    %c0_26 = arith.constant 0 : index
    %c0_27 = arith.constant 0 : index
    %48 = vector.load %arg5[%c0_25, %c0_26, %c0_27] : memref<1x64x64xf32, #tpu.memory_space<vmem>>, vector<1x64x64xf32>
    %49 = vector.shape_cast %48 : vector<1x64x64xf32> to vector<64x64xf32>
    %50 = vector.shape_cast %47 : vector<64x64xf32> to vector<1x64x64xf32>
    tpu.vector_store %arg5[%c0_25, %c0_26, %c0_27], %50 {strides = array<i32>} : memref<1x64x64xf32, #tpu.memory_space<vmem>>, vector<1x64x64xf32>,
    %51 = tpu.concatenate %17, %46 in 1 : vector<64x48xf32>, vector<64x80xf32> -> vector<64x128xf32>
    %c0_28 = arith.constant 0 : index
    %c0_29 = arith.constant 0 : index
    %c0_30 = arith.constant 0 : index
    %52 = vector.load %arg6[%c0_28, %c0_29, %c0_30] : memref<1x64x128xf32, #tpu.memory_space<vmem>>, vector<1x64x128xf32>
    %53 = vector.shape_cast %52 : vector<1x64x128xf32> to vector<64x128xf32>
    %54 = vector.shape_cast %51 : vector<64x128xf32> to vector<1x64x128xf32>
    tpu.vector_store %arg6[%c0_28, %c0_29, %c0_30], %54 {strides = array<i32>} : memref<1x64x128xf32, #tpu.memory_space<vmem>>, vector<1x64x128xf32>,
    return
  }
  func.func @transform_0(%arg0: i32) -> (i32, i32, i32) {
    %c0_i32 = arith.constant 0 : i32
    %c0_i32_0 = arith.constant 0 : i32
    %c0_i32_1 = arith.constant 0 : i32
    return %arg0, %c0_i32, %c0_i32_0 : i32, i32, i32
  }
  func.func @transform_1(%arg0: i32) -> (i32, i32, i32) {
    %c0_i32 = arith.constant 0 : i32
    %c0_i32_0 = arith.constant 0 : i32
    %c0_i32_1 = arith.constant 0 : i32
    return %arg0, %c0_i32, %c0_i32_0 : i32, i32, i32
  }
  func.func @transform_2(%arg0: i32) -> (i32, i32) {
    %c0_i32 = arith.constant 0 : i32
    %c0_i32_0 = arith.constant 0 : i32
    %c0_i32_1 = arith.constant 0 : i32
    return %c0_i32, %c0_i32_0 : i32, i32
  }
  func.func @transform_3(%arg0: i32) -> (i32, i32) {
    %c0_i32 = arith.constant 0 : i32
    %c0_i32_0 = arith.constant 0 : i32
    %c0_i32_1 = arith.constant 0 : i32
    return %c0_i32, %c0_i32_0 : i32, i32
  }
  func.func @transform_4(%arg0: i32) -> (i32, i32, i32) {
    %c0_i32 = arith.constant 0 : i32
    %c0_i32_0 = arith.constant 0 : i32
    %c0_i32_1 = arith.constant 0 : i32
    return %arg0, %c0_i32, %c0_i32_0 : i32, i32, i32
  }
  func.func @transform_5(%arg0: i32) -> (i32, i32, i32) {
    %c0_i32 = arith.constant 0 : i32
    %c0_i32_0 = arith.constant 0 : i32
    %c0_i32_1 = arith.constant 0 : i32
    return %arg0, %c0_i32, %c0_i32_0 : i32, i32, i32
  }
}

</mosaic_0001>

<bundles_post_ra>
// kernel: tpu_custom_call.1
= control target key start
LH: loop header
LB: loop body
LE: loop exit
PB: predicated region body
PF: predicated region fallthrough
CT: control target
= control target key end

     0   :  { %11 = vsyncpa [#allocation3], 0  ;;  %s1706_s0 = inlined_call_operand.vmem [shape: bf16[2,64,32], index: 0, kind: input, shape index: {}]   ;;  %s1707_s1 = inlined_call_operand.vmem [shape: bf16[2,64,64], index: 1, kind: input, shape index: {}]   ;;  %s1708_s2 = inlined_call_operand.vmem [shape: bf16[176,80], index: 2, kind: input, shape index: {}]   ;;  %s1709_s3 = inlined_call_operand.vmem [shape: f32[1,176], index: 3, kind: input, shape index: {}]   ;;  %s1710_s4 = inlined_call_operand.hbm [shape: f32[2,64,64], index: 4, kind: output, shape index: {0}]   ;;  %s1711_s5 = inlined_call_operand.hbm [shape: f32[2,64,128], index: 5, kind: output, shape index: {1}]  }
   0x1   :  { %13 = vsyncpa [#allocation3 + $0x1], 0 }
   0x2   :  { %14 = vsyncpa [#allocation5], 0 }
   0x3   :  { %16 = vsyncpa [#allocation5 + $0x1], 0  ;;  %s1423_s18 = smov 0   ;;  %s1425_s19 = smov 0  }
   0x4   :  { %s1427_s20 = smov 0   ;;  %s1429_s21 = smov 0  }
   0x5 LB: > { %s1444_s22 = sadd.s32 4294967295, %s1386_s21   ;;  %s1046_s23 = sadd.s32 4294967294, %s1386_s21   ;;  %s1386_s21 = sphi %s1429_s21, %s1717_s21   ;;  %s1382_s20 = sphi %s1427_s20, %s1716_s20   ;;  %s1378_s19 = sphi %s1425_s19, %s1715_s19   ;;  %s1374_s18 = sphi %s1423_s18, %s1714_s18  }
   0x6   : > { %s1448_s24 = sadd.s32 1, %s1386_s21   ;;  %s123_s25 = sadd.s32 1, %s1382_s20 }
   0x7   : > { %s120_s26 = ssub.s32 %s1386_s21, %s1448_s24  ;;  %p133_p0 = scmp.ne.s32.totalorder %s1382_s20, %s1378_s19 }
   0x8   : > { %p121_p1 = scmp.eq.s32.totalorder %s120_s26, 0  ;;  %p134_p2 = scmp.eq.s32.totalorder %s1444_s22, 1 }
   0x9   : > { %p139_p3 = scmp.ne.s32.totalorder %s1378_s19, %s1374_s18  ;;  %p140_p4 = scmp.eq.s32.totalorder %s1046_s23, 1 }
   0xa   : > { %s1459_s27 = scalar_select %p121_p1, %s1382_s20, %s123_s25  }
   0xb   : > { %p1461_p5 = por %p134_p2, %p133_p0  ;;  %p1465_p6 = por %p140_p4, %p139_p3 }
   0xc   : > { %p1049_p7 = scmp.ge.s32.totalorder %s1386_s21, 1  ;;  %p206_p8 = scmp.lt.s32.totalorder %s1386_s21, 3 }
   0xe   : > { %p207_p9 = pnand %p1049_p7, %p206_p8 }
   0xf   : > { %p244_p10 = scmp.lt.s32.totalorder (!%p207_p9), %s1444_s22, 1  ;;  %s1388_s30 = smov (!%p207_p9), 96  }
  0x10   : > { %210 = sbr.rel (%p207_p9) target bundleno = 1429 (0x595), region = 36  ;;  %s1389_s14 = smov (!%p207_p9), 32  }
  0x11   : > { %s1581_s15 = sand.u32 (!%p207_p9), 1, %s1378_s19   ;;  %s1209_s11 = sshll.u32 (!%p207_p9), %s1444_s22, 6 }
  0x12   : > { %s1050_s23 = sshll.u32 (!%p207_p9), %s1581_s15, 6  ;;  %s902_s26 = scalar_lea.sflag (!%p207_p9), [#allocation3], %s1581_s15 }
  0x13   : > { %s1589_s25 = scalar_lea.vmem (!%p207_p9), [#allocation2], %s1050_s23 }
  0x15   : > { %v1199_v0 = vld [vmem:[%s1708_s2 + $0x8] sm:$0xff]  ;;  %v1198_v1 = vld [vmem:[%s1708_s2] sm:$0xff]  ;;  %s245_s9 = scalar_select %p244_p10, %s1444_s22, 1  ;;  %vm325_vm0 = vcmask 261120   ;;  %vm391_vm1 = vcmask 523264   ;;  %v1201_v22 = vld [vmem:[%s1708_s2 + $0x18] sm:$0xff] }
  0x16   : > { %344 = vmatpush.bf16.msra.mxu0 %v1199_v0  ;;  %475 = vmatpush.bf16.msra.mxu2 %v1201_v22  ;;  %v1200_v23 = vld [vmem:[%s1708_s2 + $0x10] sm:$0xff]  ;;  %v1202_v62 = vld [vmem:[%s1708_s2 + $0x20] sm:$0xff]  ;;  %vm557_vm2 = vcmask 130048  }
  0x17   : > { %s1188_s10 = sshll.u32 %s245_s9, 5  ;;  %s1312_s9 = scalar_lea.hbm %s1710_s4, 128 }
  0x18   : > { %s248_s13 = scalar_lea.vmem %s1706_s0, %s1188_s10  ;;  %s253_s16 = scalar_lea.vmem %s1707_s1, %s1188_s10 }
  0x19   : > { %v1190_v2 = vld [vmem:[%s248_s13] sm:$0xff]  ;;  %v1191_v3 = vld [vmem:[%s248_s13 + $0x8] sm:$0xff]  ;;  %v1192_v4 = vld [vmem:[%s248_s13 + $0x10] sm:$0xff]  ;;  %s1390_s10 = smov 48  }
  0x1a   : > { %345 = vmatpush.bf16.msra.mxu0 %v1198_v1  ;;  %v1193_v5 = vld [vmem:[%s248_s13 + $0x18] sm:$0xff]  ;;  %v1194_v18 = vld [vmem:[%s253_s16] sm:$0xff]  ;;  %v1195_v19 = vld [vmem:[%s253_s16 + $0x8] sm:$0xff]  ;;  %476 = vmatpush.bf16.msra.mxu2 %v1200_v23 }
  0x1b   : > { %v1196_v20 = vld [vmem:[%s253_s16 + $0x10] sm:$0xff]  ;;  %v1197_v21 = vld [vmem:[%s253_s16 + $0x18] sm:$0xff]  ;;  %s919_s16 = sshll.u32 %s1589_s25, 4  ;;  %s920_s16 = int_to_ptr.vmem [resolvable:$true] %s919_s16 }
  0x1d   : > { %1080 = vmatmul.msk.bf16.vlgmr.msra.gmra.mxu0 %vm325_vm0, %v1190_v2 }
  0x1e   : > { %577 = vmatpush.bf16.msrb.mxu0 %v1202_v62 }
  0x2d   : > { %1081 = vmatmul.msk.bf16.gmra.mxu0 %vm325_vm0, %v1191_v3 }
  0x3d   : > { %1082 = vmatmul.msk.bf16.gmra.mxu0 %vm325_vm0, %v1192_v4 }
  0x4d   : > { %1083 = vmatmul.msk.bf16.gmra.mxu0 %vm325_vm0, %v1193_v5 }
  0x9a   : > { %v347_v6 = vpop.f32.mrf.mxu0 }
  0xa2   : > { %v349_v7 = vpop.f32.mrf.mxu0 }
  0xa3   : > { %v367_v17 = vpack.c.bf16 %v349_v7, %v347_v6 }
  0xaa   : > { %v352_v8 = vpop.f32.mrf.mxu0 }
  0xb2   : > { %v354_v9 = vpop.f32.mrf.mxu0 }
  0xb3   : > { %v368_v16 = vpack.c.bf16 %v354_v9, %v352_v8 }
  0xba   : > { %v357_v10 = vpop.f32.mrf.mxu0 }
  0xc2   : > { %v359_v11 = vpop.f32.mrf.mxu0 }
  0xc3   : > { %v369_v15 = vpack.c.bf16 %v359_v11, %v357_v10  ;;  %v1204_v10 = vld [vmem:[%s1708_s2 + $0x30] sm:$0xff] }
  0xc4   : > { %676 = vmatpush.bf16.msrb.mxu2 %v1204_v10 }
  0xca   : > { %v362_v12 = vpop.f32.mrf.mxu0 }
  0xd2   : > { %v364_v13 = vpop.f32.mrf.mxu0 }
  0xd3   : > { %v370_v14 = vpack.c.bf16 %v364_v13, %v362_v12 }
  0xd5   : > { %408 = vmatpush.bf16.msra.mxu1 %v370_v14  ;;  %v1203_v14 = vld [vmem:[%s1708_s2 + $0x28] sm:$0xff] }
  0xd6   : > { %677 = vmatpush.bf16.msrb.mxu2 %v1203_v14 }
  0xd9   : > { %409 = vmatpush.bf16.msra.mxu1 %v369_v15  ;;  %v1556_v15 = vld [vmem:[%s1709_s3] sm:$0x3] }
  0xdd   : > { %410 = vmatpush.bf16.msra.mxu1 %v368_v16  ;;  %v1559_v16 = vperm.slane %v1556_v15, 0 }
  0xdf   : > { %655 = vrot.lane.b32.xlu2 %v1559_v16, %s1388_s30 }
  0xe1   : > { %411 = vmatpush.bf16.msra.mxu1 %v367_v17 }
  0xe4   : > { %1100 = vmatmul.msk.bf16.vlgmr.msra.gmra.mxu1 %vm391_vm1, %v1194_v18 }
  0xe7   : > { %768 = vrot.lane.b32.xlu2 %v1559_v16, %s1389_s14 }
  0xf4   : > { %1101 = vmatmul.msk.bf16.gmra.mxu1 %vm391_vm1, %v1195_v19 }
 0x104   : > { %1102 = vmatmul.msk.bf16.gmra.mxu1 %vm391_vm1, %v1196_v20 }
 0x114   : > { %1103 = vmatmul.msk.bf16.gmra.mxu1 %vm391_vm1, %v1197_v21 }
 0x161   : > { %v413_v24 = vpop.f32.mrf.mxu1 }
 0x162   : > { %v433_v26 = vmax.f32 %v413_v24, 0.0 }
 0x169   : > { %v415_v25 = vpop.f32.mrf.mxu1 }
 0x16a   : > { %v434_v27 = vmax.f32 %v415_v25, 0.0 }
 0x16c   : > { %v441_v28 = vpack.c.bf16 %v434_v27, %v433_v26 }
 0x16e   : > { %1112 = vmatmul.msk.bf16.vlgmr.msra.gmra.mxu2 %vm325_vm0, %v441_v28 }
 0x171   : > { %v418_v29 = vpop.f32.mrf.mxu1 }
 0x172   : > { %v435_v31 = vmax.f32 %v418_v29, 0.0 }
 0x179   : > { %v420_v30 = vpop.f32.mrf.mxu1 }
 0x17a   : > { %v436_v32 = vmax.f32 %v420_v30, 0.0 }
 0x17c   : > { %v442_v33 = vpack.c.bf16 %v436_v32, %v435_v31 }
 0x17e   : > { %1113 = vmatmul.msk.bf16.gmra.mxu2 %vm325_vm0, %v442_v33 }
 0x181   : > { %v423_v34 = vpop.f32.mrf.mxu1 }
 0x182   : > { %v437_v36 = vmax.f32 %v423_v34, 0.0 }
 0x189   : > { %v425_v35 = vpop.f32.mrf.mxu1 }
 0x18a   : > { %v438_v37 = vmax.f32 %v425_v35, 0.0 }
 0x18c   : > { %v443_v38 = vpack.c.bf16 %v438_v37, %v437_v36 }
 0x18e   : > { %1114 = vmatmul.msk.bf16.gmra.mxu2 %vm325_vm0, %v443_v38 }
 0x191   : > { %v428_v39 = vpop.f32.mrf.mxu1 }
 0x192   : > { %v439_v41 = vmax.f32 %v428_v39, 0.0 }
 0x199   : > { %v430_v40 = vpop.f32.mrf.mxu1 }
 0x19a   : > { %v440_v42 = vmax.f32 %v430_v40, 0.0 }
 0x19c   : > { %v444_v43 = vpack.c.bf16 %v440_v42, %v439_v41 }
 0x19e   : > { %1115 = vmatmul.msk.bf16.gmra.mxu2 %vm325_vm0, %v444_v43 }
 0x1f1   : > { %v478_v44 = vpop.f32.mrf.mxu2 }
 0x1f9   : > { %v480_v45 = vpop.f32.mrf.mxu2 }
 0x1fa   : > { %v498_v55 = vpack.c.bf16 %v480_v45, %v478_v44 }
 0x201   : > { %v483_v46 = vpop.f32.mrf.mxu2 }
 0x209   : > { %v485_v47 = vpop.f32.mrf.mxu2 }
 0x20a   : > { %v499_v54 = vpack.c.bf16 %v485_v47, %v483_v46 }
 0x211   : > { %v488_v48 = vpop.f32.mrf.mxu2 }
 0x219   : > { %v490_v49 = vpop.f32.mrf.mxu2 }
 0x21a   : > { %v500_v53 = vpack.c.bf16 %v490_v49, %v488_v48 }
 0x221   : > { %v493_v50 = vpop.f32.mrf.mxu2 }
 0x229   : > { %v495_v51 = vpop.f32.mrf.mxu2 }
 0x22a   : > { %v501_v52 = vpack.c.bf16 %v495_v51, %v493_v50 }
 0x22c   : > { %506 = vmatpush.bf16.msra.mxu3 %v501_v52 }
 0x230   : > { %507 = vmatpush.bf16.msra.mxu3 %v500_v53 }
 0x234   : > { %508 = vmatpush.bf16.msra.mxu3 %v499_v54 }
 0x238   : > { %509 = vmatpush.bf16.msra.mxu3 %v498_v55 }
 0x23b   : > { %1116 = vmatmul.msk.bf16.vlgmr.msra.gmra.mxu3 %vm391_vm1, %v1194_v18 }
 0x24b   : > { %1117 = vmatmul.msk.bf16.gmra.mxu3 %vm391_vm1, %v1195_v19 }
 0x25b   : > { %1118 = vmatmul.msk.bf16.gmra.mxu3 %vm391_vm1, %v1196_v20 }
 0x26b   : > { %1119 = vmatmul.msk.bf16.gmra.mxu3 %vm391_vm1, %v1197_v21 }
 0x2be   : > { %v1507_v56 = vpop.f32.mrf.mxu3 }
 0x2c6   : > { %v1509_v57 = vpop.f32.mrf.mxu3 }
 0x2c7   : > { %v531_v58 = vpack.c.bf16 %v1509_v57, %v1507_v56 }
 0x2c9   : > { %543 = vrot.lane.b32.xlu0 %v531_v58, %s1388_s30 }
 0x2ce   : > { %v1514_v59 = vpop.f32.mrf.mxu3 }
 0x2d6   : > { %v1516_v60 = vpop.f32.mrf.mxu3 }
 0x2d7   : > { %v532_v61 = vpack.c.bf16 %v1516_v60, %v1514_v59 }
 0x2d9   : > { %545 = vrot.lane.b32.xlu0 %v532_v61, %s1388_s30 }
 0x2de   : > { %v1524_v63 = vpop.f32.mrf.mxu3 }
 0x2e6   : > { %v1526_v0 = vpop.f32.mrf.mxu3 }
 0x2e7   : > { %v533_v1 = vpack.c.bf16 %v1526_v0, %v1524_v63 }
 0x2e9   : > { %547 = vrot.lane.b32.xlu1 %v533_v1, %s1388_s30 }
 0x2ee   : > { %v1531_v2 = vpop.f32.mrf.mxu3 }
 0x2f6   : > { %v1533_v3 = vpop.f32.mrf.mxu3 }
 0x2f7   : > { %v534_v4 = vpack.c.bf16 %v1533_v3, %v1531_v2 }
 0x2f9   : > { %549 = vrot.lane.b32.xlu1 %v534_v4, %s1388_s30 }
 0x33b   : > { %v544_v5 = vpop.permute.xlu0 %543 }
 0x33c   : > { %1124 = vmatmul.msk.bf16.vlgmr.msrb.gmra.mxu0 %vm557_vm2, %v544_v5  ;;  %v559_v13 = vsel %vm557_vm2, %v544_v5, 0 }
 0x34b   : > { %v546_v6 = vpop.permute.xlu0 %545 }
 0x34c   : > { %1125 = vmatmul.msk.bf16.gmra.mxu0 %vm557_vm2, %v546_v6  ;;  %v562_v12 = vsel %vm557_vm2, %v546_v6, 0 }
 0x35b   : > { %v548_v7 = vpop.permute.xlu1 %547 }
 0x35c   : > { %1126 = vmatmul.msk.bf16.gmra.mxu0 %vm557_vm2, %v548_v7  ;;  %v565_v11 = vsel %vm557_vm2, %v548_v7, 0 }
 0x36b   : > { %v550_v8 = vpop.permute.xlu1 %549 }
 0x36c   : > { %1127 = vmatmul.msk.bf16.gmra.mxu0 %vm557_vm2, %v550_v8  ;;  %v568_v9 = vsel %vm557_vm2, %v550_v8, 0 }
 0x36d   : > { %819 = vmatpush.bf16.xpose.msrb.mxu3 %v568_v9 }
 0x375   : > { %820 = vmatpush.bf16.xpose.msrb.mxu3 %v565_v11 }
 0x37d   : > { %821 = vmatpush.bf16.xpose.msrb.mxu3 %v562_v12 }
 0x385   : > { %822 = vmatpush.bf16.xpose.msrb.mxu3 %v559_v13  ;;  %v1208_v13 = vld [vmem:[%s1708_s2 + $0x50] sm:$0xff] }
 0x386   : > { %790 = vmatpush.bf16.msrb.mxu1 %v1208_v13 }
 0x38c   : > { %1176 = vmatmul.msk.bf16.vlgmr.msrb.gmra.mxu3 %vm557_vm2, %v544_v5 }
 0x39c   : > { %1177 = vmatmul.msk.bf16.gmra.mxu3 %vm557_vm2, %v546_v6 }
 0x3ac   : > { %1178 = vmatmul.msk.bf16.gmra.mxu3 %vm557_vm2, %v548_v7 }
 0x3b9   : > { %v579_v17 = vpop.f32.mrf.mxu0 }
 0x3ba   : > { %v580_v18 = vadd.f32 %v579_v17, %v1559_v16  ;;  %v1207_v17 = vld [vmem:[%s1708_s2 + $0x48] sm:$0xff] }
 0x3bb   : > { %791 = vmatpush.bf16.msrb.mxu1 %v1207_v17 }
 0x3bc   : > { %1179 = vmatmul.msk.bf16.gmra.mxu3 %vm557_vm2, %v550_v8  ;;  %v607_v19 = vmul.f32 1.442695, %v580_v18  ;;  %vm599_vm3 = vcmp.gt.f32.partialorder %v580_v18, 0.0 }
 0x3be   : > { %1260 = vpow2.f32 %v607_v19 }
 0x3c1   : > { %v581_v20 = vpop.f32.mrf.mxu0 }
 0x3c2   : > { %v582_v21 = vadd.f32 %v581_v20, %v1559_v16  ;;  %v1206_v20 = vld [vmem:[%s1708_s2 + $0x40] sm:$0xff] }
 0x3c3   : > { %792 = vmatpush.bf16.msrb.mxu1 %v1206_v20 }
 0x3c4   : > { %v609_v22 = vmul.f32 1.442695, %v582_v21  ;;  %v1261_v23 = vpop.eup %1260  ;;  %vm600_vm4 = vcmp.gt.f32.partialorder %v582_v21, 0.0 }
 0x3c5   : > { %v1128_v26 = vadd.f32 -1.0, %v1261_v23 }
 0x3c6   : > { %1262 = vpow2.f32 %v609_v22 }
 0x3c7   : > { %v631_v30 = vsel %vm599_vm3, %v580_v18, %v1128_v26  ;;  %v656_v26 = vpop.permute.xlu2 %655 }
 0x3c9   : > { %v584_v24 = vpop.f32.mrf.mxu0 }
 0x3ca   : > { %v585_v25 = vadd.f32 %v584_v24, %v1559_v16 }
 0x3cc   : > { %v1263_v27 = vpop.eup %1262  ;;  %v611_v29 = vmul.f32 1.442695, %v585_v25  ;;  %vm601_vm5 = vcmp.gt.f32.partialorder %v585_v25, 0.0 }
 0x3cd   : > { %v1129_v28 = vadd.f32 -1.0, %v1263_v27 }
 0x3ce   : > { %1264 = vpow2.f32 %v611_v29  ;;  %v743_v29 = vperm.slane %v1556_v15, 1 }
 0x3cf   : > { %v632_v31 = vsel %vm600_vm4, %v582_v21, %v1129_v28 }
 0x3d0   : > { %v639_v32 = vpack.c.bf16 %v632_v31, %v631_v30  ;;  %770 = vrot.lane.b32.xlu0 %v743_v29, %s1389_s14  ;;  %s918_s14 = scalar_lea.hbm %s1710_s4, %s1209_s11 }
 0x3d1   : > { %v586_v33 = vpop.f32.mrf.mxu0  ;;  %s921_s17 = sshll.u32 %s918_s14, 4  ;;  %s922_s17 = int_to_ptr.hbm [resolvable:$true] %s921_s17 }
 0x3d2   : > { %v587_v34 = vadd.f32 %v586_v33, %v1559_v16  ;;  %1144 = vmatmul.msk.bf16.vlgmr.msrb.gmra.mxu2 %vm325_vm0, %v639_v32  ;;  %s1306_s30 = sshra.s32 %s922_s17, 4  ;;  %s1307_s30 = int_to_ptr.hbm [resolvable:$true] %s1306_s30 }
 0x3d3   : > { %s1308_s6 = scalar_lea.hbm %s1307_s30, 64  ;;  %p1313_p0 = scmp.lt.s32.totalorder %s1307_s30, %s1710_s4 }
 0x3d4   : > { %v613_v35 = vmul.f32 1.442695, %v587_v34  ;;  %v1265_v36 = vpop.eup %1264  ;;  %vm602_vm6 = vcmp.gt.f32.partialorder %v587_v34, 0.0  ;;  %p1309_p11 = scmp.ne.s32.totalorder %s1307_s30, %s1308_s6  ;;  %p1314_p1 = scmp.lt.s32.totalorder %s1312_s9, %s1308_s6 }
 0x3d5   : > { %v1130_v39 = vadd.f32 -1.0, %v1265_v36 }
 0x3d6   : > { %1266 = vpow2.f32 %v613_v35  ;;  %p1310_p12 = pnand %p1309_p11, %p1461_p5  ;;  %p1315_p2 = por %p1314_p1, %p1313_p0 }
 0x3d7   : > { %v633_v43 = vsel %vm601_vm5, %v585_v25, %v1130_v39  ;;  %v1205_v25 = vld [vmem:[%s1708_s2 + $0x38] sm:$0xff] }
 0x3d8   : > { %793 = vmatpush.bf16.msrb.mxu1 %v1205_v25  ;;  %p1311_p13 = pneg %p1310_p12 }
 0x3d9   : > { %v589_v37 = vpop.f32.mrf.mxu0 }
 0x3da   : > { %v590_v38 = vadd.f32 %v589_v37, %v1559_v16  ;;  %p1316_p3 = pnand %p1315_p2, %p1311_p13 }
 0x3dc   : > { %v1267_v40 = vpop.eup %1266  ;;  %v615_v42 = vmul.f32 1.442695, %v590_v38  ;;  %vm603_vm7 = vcmp.gt.f32.partialorder %v590_v38, 0.0 }
 0x3dd   : > { %v1131_v41 = vadd.f32 -1.0, %v1267_v40 }
 0x3de   : > { %1268 = vpow2.f32 %v615_v42 }
 0x3df   : > { %v634_v44 = vsel %vm602_vm6, %v587_v34, %v1131_v41 }
 0x3e0   : > { %v640_v45 = vpack.c.bf16 %v634_v44, %v633_v43 }
 0x3e1   : > { %v591_v46 = vpop.f32.mrf.mxu0 }
 0x3e2   : > { %v592_v47 = vadd.f32 %v591_v46, %v1559_v16  ;;  %1145 = vmatmul.msk.bf16.gmra.mxu2 %vm325_vm0, %v640_v45 }
 0x3e4   : > { %v617_v48 = vmul.f32 1.442695, %v592_v47  ;;  %v1269_v49 = vpop.eup %1268  ;;  %vm604_vm8 = vcmp.gt.f32.partialorder %v592_v47, 0.0 }
 0x3e5   : > { %v1132_v52 = vadd.f32 -1.0, %v1269_v49 }
 0x3e6   : > { %1270 = vpow2.f32 %v617_v48 }
 0x3e7   : > { %v635_v58 = vsel %vm603_vm7, %v590_v38, %v1132_v52 }
 0x3e9   : > { %v594_v50 = vpop.f32.mrf.mxu0 }
 0x3ea   : > { %v595_v51 = vadd.f32 %v594_v50, %v1559_v16 }
 0x3ec   : > { %v1271_v53 = vpop.eup %1270  ;;  %v619_v55 = vmul.f32 1.442695, %v595_v51  ;;  %vm605_vm9 = vcmp.gt.f32.partialorder %v595_v51, 0.0 }
 0x3ed   : > { %v1133_v54 = vadd.f32 -1.0, %v1271_v53 }
 0x3ee   : > { %1272 = vpow2.f32 %v619_v55 }
 0x3ef   : > { %v636_v61 = vsel %vm604_vm8, %v592_v47, %v1133_v54 }
 0x3f0   : > { %v641_v62 = vpack.c.bf16 %v636_v61, %v635_v58 }
 0x3f1   : > { %v596_v1 = vpop.f32.mrf.mxu0 }
 0x3f2   : > { %v597_v4 = vadd.f32 %v596_v1, %v1559_v16  ;;  %1146 = vmatmul.msk.bf16.gmra.mxu2 %vm325_vm0, %v641_v62 }
 0x3f4   : > { %v621_v5 = vmul.f32 1.442695, %v597_v4  ;;  %v1273_v6 = vpop.eup %1272  ;;  %vm606_vm10 = vcmp.gt.f32.partialorder %v597_v4, 0.0 }
 0x3f5   : > { %v1134_v7 = vadd.f32 -1.0, %v1273_v6 }
 0x3f6   : > { %1274 = vpow2.f32 %v621_v5 }
 0x3f7   : > { %v637_v10 = vsel %vm605_vm9, %v595_v51, %v1134_v7 }
 0x3fc   : > { %v1275_v8 = vpop.eup %1274 }
 0x3fd   : > { %v1135_v9 = vadd.f32 -1.0, %v1275_v8 }
 0x3ff   : > { %v638_v11 = vsel %vm606_vm10, %v597_v4, %v1135_v9 }
 0x400   : > { %v642_v12 = vpack.c.bf16 %v638_v11, %v637_v10 }
 0x402   : > { %1147 = vmatmul.msk.bf16.gmra.mxu2 %vm325_vm0, %v642_v12 }
 0x40f   : > { %v824_v14 = vpop.f32.mrf.mxu3 }
 0x410   : > { %844 = vst.msk [vmem:[%s1589_s25] sm:$0xff] %vm391_vm1, %v824_v14 }
 0x417   : > { %v826_v16 = vpop.f32.mrf.mxu3 }
 0x418   : > { %845 = vst.msk [vmem:[%s1589_s25 + $0x8] sm:$0xff] %vm391_vm1, %v826_v16 }
 0x41f   : > { %v829_v18 = vpop.f32.mrf.mxu3 }
 0x420   : > { %846 = vst.msk [vmem:[%s1589_s25 + $0x10] sm:$0xff] %vm391_vm1, %v829_v18 }
 0x427   : > { %v831_v19 = vpop.f32.mrf.mxu3 }
 0x428   : > { %847 = vst.msk [vmem:[%s1589_s25 + $0x18] sm:$0xff] %vm391_vm1, %v831_v19 }
 0x42f   : > { %v834_v21 = vpop.f32.mrf.mxu3 }
 0x430   : > { %848 = vst.msk [vmem:[%s1589_s25 + $0x20] sm:$0xff] %vm391_vm1, %v834_v21 }
 0x437   : > { %v836_v22 = vpop.f32.mrf.mxu3 }
 0x438   : > { %849 = vst.msk [vmem:[%s1589_s25 + $0x28] sm:$0xff] %vm391_vm1, %v836_v22 }
 0x43f   : > { %v839_v23 = vpop.f32.mrf.mxu3 }
 0x440   : > { %850 = vst.msk [vmem:[%s1589_s25 + $0x30] sm:$0xff] %vm391_vm1, %v839_v23 }
 0x442   : > { %v771_v25 = vpop.permute.xlu0 %770 }
 0x447   : > { %v841_v24 = vpop.f32.mrf.mxu3 }
 0x448   : > { %851 = vst.msk [vmem:[%s1589_s25 + $0x38] sm:$0xff] %vm391_vm1, %v841_v24  ;;  %v769_v24 = vpop.permute.xlu2 %768 }
 0x455   : > { %v679_v27 = vpop.f32.mrf.mxu2 }
 0x456   : > { %v680_v28 = vadd.f32 %v679_v27, %v656_v26  ;;  %v772_v27 = vsel %vm325_vm0, %v769_v24, %v771_v25 }
 0x458   : > { %v707_v30 = vmul.f32 1.442695, %v680_v28  ;;  %vm699_vm11 = vcmp.gt.f32.partialorder %v680_v28, 0.0 }
 0x45a   : > { %1276 = vpow2.f32 %v707_v30 }
 0x45d   : > { %v681_v31 = vpop.f32.mrf.mxu2 }
 0x45e   : > { %v682_v32 = vadd.f32 %v681_v31, %v656_v26 }
 0x460   : > { %v709_v33 = vmul.f32 1.442695, %v682_v32  ;;  %v1277_v34 = vpop.eup %1276  ;;  %vm700_vm12 = vcmp.gt.f32.partialorder %v682_v32, 0.0 }
 0x461   : > { %v1148_v37 = vadd.f32 -1.0, %v1277_v34 }
 0x462   : > { %1278 = vpow2.f32 %v709_v33 }
 0x463   : > { %v731_v41 = vsel %vm699_vm11, %v680_v28, %v1148_v37 }
 0x465   : > { %v684_v35 = vpop.f32.mrf.mxu2 }
 0x466   : > { %v685_v36 = vadd.f32 %v684_v35, %v656_v26 }
 0x468   : > { %v1279_v38 = vpop.eup %1278  ;;  %v711_v40 = vmul.f32 1.442695, %v685_v36  ;;  %vm701_vm13 = vcmp.gt.f32.partialorder %v685_v36, 0.0 }
 0x469   : > { %v1149_v39 = vadd.f32 -1.0, %v1279_v38 }
 0x46a   : > { %1280 = vpow2.f32 %v711_v40 }
 0x46b   : > { %v732_v42 = vsel %vm700_vm12, %v682_v32, %v1149_v39 }
 0x46c   : > { %v739_v15 = vpack.c.bf16 %v732_v42, %v731_v41 }
 0x46d   : > { %v686_v43 = vpop.f32.mrf.mxu2 }
 0x46e   : > { %v687_v44 = vadd.f32 %v686_v43, %v656_v26  ;;  %1172 = vmatmul.msk.bf16.vlgmr.msrb.gmra.mxu1 %vm391_vm1, %v739_v15 }
 0x470   : > { %v713_v45 = vmul.f32 1.442695, %v687_v44  ;;  %v1281_v46 = vpop.eup %1280  ;;  %vm702_vm14 = vcmp.gt.f32.partialorder %v687_v44, 0.0 }
 0x471   : > { %v1150_v49 = vadd.f32 -1.0, %v1281_v46 }
 0x472   : > { %1282 = vpow2.f32 %v713_v45 }
 0x473   : > { %v733_v53 = vsel %vm701_vm13, %v685_v36, %v1150_v49 }
 0x475   : > { %v689_v47 = vpop.f32.mrf.mxu2 }
 0x476   : > { %v690_v48 = vadd.f32 %v689_v47, %v656_v26 }
 0x478   : > { %v1283_v50 = vpop.eup %1282  ;;  %v715_v52 = vmul.f32 1.442695, %v690_v48  ;;  %vm703_vm15 = vcmp.gt.f32.partialorder %v690_v48, 0.0 }
 0x479   : > { %v1151_v51 = vadd.f32 -1.0, %v1283_v50 }
 0x47a   : > { %1284 = vpow2.f32 %v715_v52 }
 0x47b   : > { %v734_v54 = vsel %vm702_vm14, %v687_v44, %v1151_v51 }
 0x47c   : > { %v740_v55 = vpack.c.bf16 %v734_v54, %v733_v53 }
 0x47d   : > { %v691_v58 = vpop.f32.mrf.mxu2 }
 0x47e   : > { %v692_v61 = vadd.f32 %v691_v58, %v656_v26  ;;  %1173 = vmatmul.msk.bf16.gmra.mxu1 %vm391_vm1, %v740_v55 }
 0x480   : > { %v717_v62 = vmul.f32 1.442695, %v692_v61  ;;  %v1285_v1 = vpop.eup %1284  ;;  %vm704_vm2 = vcmp.gt.f32.partialorder %v692_v61, 0.0 }
 0x481   : > { %v1152_v6 = vadd.f32 -1.0, %v1285_v1 }
 0x482   : > { %1286 = vpow2.f32 %v717_v62 }
 0x483   : > { %v735_v10 = vsel %vm703_vm15, %v690_v48, %v1152_v6 }
 0x485   : > { %v694_v4 = vpop.f32.mrf.mxu2 }
 0x486   : > { %v695_v5 = vadd.f32 %v694_v4, %v656_v26 }
 0x488   : > { %v1287_v7 = vpop.eup %1286  ;;  %v719_v9 = vmul.f32 1.442695, %v695_v5  ;;  %vm705_vm3 = vcmp.gt.f32.partialorder %v695_v5, 0.0 }
 0x489   : > { %v1153_v8 = vadd.f32 -1.0, %v1287_v7 }
 0x48a   : > { %1288 = vpow2.f32 %v719_v9 }
 0x48b   : > { %v736_v11 = vsel %vm704_vm2, %v692_v61, %v1153_v8 }
 0x48c   : > { %v741_v12 = vpack.c.bf16 %v736_v11, %v735_v10 }
 0x48d   : > { %v696_v13 = vpop.f32.mrf.mxu2 }
 0x48e   : > { %v697_v14 = vadd.f32 %v696_v13, %v656_v26  ;;  %1174 = vmatmul.msk.bf16.gmra.mxu1 %vm391_vm1, %v741_v12 }
 0x490   : > { %v721_v16 = vmul.f32 1.442695, %v697_v14  ;;  %v1289_v17 = vpop.eup %1288  ;;  %vm706_vm4 = vcmp.gt.f32.partialorder %v697_v14, 0.0 }
 0x491   : > { %v1154_v18 = vadd.f32 -1.0, %v1289_v17 }
 0x492   : > { %1290 = vpow2.f32 %v721_v16 }
 0x493   : > { %v737_v21 = vsel %vm705_vm3, %v695_v5, %v1154_v18 }
 0x498   : > { %v1291_v19 = vpop.eup %1290 }
 0x499   : > { %v1155_v20 = vadd.f32 -1.0, %v1291_v19 }
 0x49b   : > { %v738_v22 = vsel %vm706_vm4, %v697_v14, %v1155_v20 }
 0x49c   : > { %v742_v23 = vpack.c.bf16 %v738_v22, %v737_v21 }
 0x49e   : > { %1175 = vmatmul.msk.bf16.gmra.mxu1 %vm391_vm1, %v742_v23 }
 0x4eb   : > { %v795_v26 = vpop.f32.mrf.mxu1 }
 0x4ec   : > { %v796_v28 = vadd.f32 %v795_v26, %v772_v27 }
 0x4ee   : > { %860 = vrot.lane.b32.xlu1 %v796_v28, %s1390_s10 }
 0x4f3   : > { %v797_v29 = vpop.f32.mrf.mxu1 }
 0x4f4   : > { %v798_v30 = vadd.f32 %v797_v29, %v772_v27 }
 0x4f6   : > { %862 = vrot.lane.b32.xlu2 %v798_v30, %s1390_s10 }
 0x4fb   : > { %v800_v31 = vpop.f32.mrf.mxu1 }
 0x4fc   : > { %v801_v32 = vadd.f32 %v800_v31, %v772_v27 }
 0x4fe   : > { %864 = vrot.lane.b32.xlu0 %v801_v32, %s1390_s10 }
 0x503   : > { %v802_v33 = vpop.f32.mrf.mxu1 }
 0x504   : > { %v803_v34 = vadd.f32 %v802_v33, %v772_v27 }
 0x506   : > { %866 = vrot.lane.b32.xlu1 %v803_v34, %s1390_s10 }
 0x50b   : > { %v805_v35 = vpop.f32.mrf.mxu1 }
 0x50c   : > { %v806_v36 = vadd.f32 %v805_v35, %v772_v27 }
 0x50e   : > { %868 = vrot.lane.b32.xlu2 %v806_v36, %s1390_s10 }
 0x513   : > { %v807_v37 = vpop.f32.mrf.mxu1 }
 0x514   : > { %v808_v38 = vadd.f32 %v807_v37, %v772_v27 }
 0x515   : > { %1319 = shalt.err (!%p1316_p3)
}
 0x516   : > { %s1391_s25 = smov 128   ;;  %s1392_s14 = smov 8   ;;  %870 = vrot.lane.b32.xlu0 %v808_v38, %s1390_s10  ;;  %vm884_vm0 = vcmask 392192  }
 0x517   : > { %1211 = dma.vmem_to_hbm [thread:$0]  (%p1461_p5), %s920_s16, 1024, %s922_s17, %s902_s26, %s1391_s25, %s1391_s25, %s1392_s14  }
 0x518   : > { %s243_s30 = scalar_lea.vmem [#allocation4], %s1050_s23  ;;  %s935_s16 = scalar_lea.hbm %s1711_s5, %s1209_s11 }
 0x519   : > { %s936_s17 = sshll.u32 %s243_s30, 4  ;;  %s938_s26 = sshll.u32 %s935_s16, 4  ;;  %s937_s17 = int_to_ptr.vmem [resolvable:$true] %s936_s17  ;;  %s939_s26 = int_to_ptr.hbm [resolvable:$true] %s938_s26 }
 0x51a   : > { %s907_s6 = scalar_lea.sflag [#allocation5], %s1581_s15  ;;  %s1334_s7 = sshra.s32 %s939_s26, 4  ;;  %s1335_s7 = int_to_ptr.hbm [resolvable:$true] %s1334_s7 }
 0x51b   : > { %v810_v39 = vpop.f32.mrf.mxu1  ;;  %s1336_s8 = scalar_lea.hbm %s1335_s7, 64  ;;  %s1340_s11 = scalar_lea.hbm %s1711_s5, 128 }
 0x51c   : > { %v811_v40 = vadd.f32 %v810_v39, %v772_v27  ;;  %p1337_p4 = scmp.ne.s32.totalorder %s1335_s7, %s1336_s8  ;;  %p1341_p9 = scmp.lt.s32.totalorder %s1335_s7, %s1711_s5 }
 0x51d   : > { %p1342_p10 = scmp.lt.s32.totalorder %s1340_s11, %s1336_s8 }
 0x51e   : > { %872 = vrot.lane.b32.xlu1 %v811_v40, %s1390_s10  ;;  %p1338_p7 = pnand %p1337_p4, %p1461_p5 }
 0x51f   : > { %p1343_p11 = por %p1342_p10, %p1341_p9 }
 0x520   : > { %p1339_p8 = pneg %p1338_p7 }
 0x522   : > { %p1344_p12 = pnand %p1343_p11, %p1339_p8 }
 0x523   : > { %v812_v41 = vpop.f32.mrf.mxu1 }
 0x524   : > { %v813_v42 = vadd.f32 %v812_v41, %v772_v27 }
 0x526   : > { %874 = vrot.lane.b32.xlu2 %v813_v42, %s1390_s10 }
 0x550   : > { %v863_v15 = vpop.permute.xlu2 %862 }
 0x551   : > { %v886_v43 = vsel %vm884_vm0, %v1509_v57, %v863_v15 }
 0x552   : > { %894 = vst [vmem:[%s243_s30 + $0x8] sm:$0xff] %v886_v43 }
 0x560   : > { %v861_v44 = vpop.permute.xlu1 %860 }
 0x561   : > { %v885_v45 = vsel %vm884_vm0, %v1507_v56, %v861_v44 }
 0x562   : > { %893 = vst [vmem:[%s243_s30] sm:$0xff] %v885_v45 }
 0x568   : > { %v869_v46 = vpop.permute.xlu2 %868 }
 0x569   : > { %v889_v47 = vsel %vm884_vm0, %v1524_v63, %v869_v46 }
 0x56a   : > { %897 = vst [vmem:[%s243_s30 + $0x20] sm:$0xff] %v889_v47 }
 0x570   : > { %v865_v48 = vpop.permute.xlu0 %864 }
 0x571   : > { %v887_v49 = vsel %vm884_vm0, %v1514_v59, %v865_v48 }
 0x572   : > { %895 = vst [vmem:[%s243_s30 + $0x10] sm:$0xff] %v887_v49 }
 0x578   : > { %v867_v57 = vpop.permute.xlu1 %866 }
 0x579   : > { %v888_v50 = vsel %vm884_vm0, %v1516_v60, %v867_v57 }
 0x57a   : > { %896 = vst [vmem:[%s243_s30 + $0x18] sm:$0xff] %v888_v50 }
 0x580   : > { %v875_v51 = vpop.permute.xlu2 %874 }
 0x581   : > { %v892_v56 = vsel %vm884_vm0, %v1533_v3, %v875_v51 }
 0x582   : > { %900 = vst [vmem:[%s243_s30 + $0x38] sm:$0xff] %v892_v56 }
 0x588   : > { %v871_v52 = vpop.permute.xlu0 %870 }
 0x589   : > { %v890_v63 = vsel %vm884_vm0, %v1526_v0, %v871_v52 }
 0x58a   : > { %898 = vst [vmem:[%s243_s30 + $0x28] sm:$0xff] %v890_v63 }
 0x590   : > { %v873_v59 = vpop.permute.xlu1 %872 }
 0x591   : > { %v891_v60 = vsel %vm884_vm0, %v1531_v2, %v873_v59 }
 0x592   : > { %899 = vst [vmem:[%s243_s30 + $0x30] sm:$0xff] %v891_v60 }
 0x593   : > { %1347 = shalt.err (!%p1344_p12)
}
 0x594   : > { %1212 = dma.vmem_to_hbm [thread:$0]  (%p1461_p5), %s937_s17, 1024, %s939_s26, %s907_s6, %s1391_s25, %s1391_s25, %s1392_s14  }
 0x595 PF: > { %p1222_p13 = scmp.ge.s32.totalorder %s1386_s21, 2  ;;  %s953_s15 = sand.u32 1, %s1374_s18  }
 0x596   : > { %s954_s30 = scalar_lea.sflag [#allocation3], %s953_s15 }
 0x597   : > { %p1216_p0 = pnand %p1222_p13, %p1465_p6 }
 0x599   : > { %p1217_p1 = pneg %p1216_p0 }
 0x59b   : > { %1365 = dma.done.wait (%p1217_p1), %s954_s30, 1024  }
 0x59c   : > { %1367 = vsyncadd (%p1217_p1), %s954_s30, 4294966272  ;;  %s964_s23 = scalar_lea.sflag [#allocation5], %s953_s15 }
 0x59d   : > { %1369 = dma.done.wait (%p1217_p1), %s964_s23, 1024  }
 0x59e   : > { %1371 = vsyncadd (%p1217_p1), %s964_s23, 4294966272  ;;  %p19_p5 = scmp.ge.s32.totalorder %s1448_s24, 4   ;;  %s1714_s18 = smov %s1378_s19 }
 0x59f   : > { %s1715_s19 = smov %s1382_s20  ;;  %s1716_s20 = smov %s1459_s27 }
 0x5a0   : > { %s1717_s21 = smov %s1448_s24  ;;  %21 = sbr.rel (!%p19_p5) target bundleno = 5 (0x5), region = 91 }
 0x5a5   :  { %970 = vsyncpa [#allocation3], 1 }
 0x5a6   :  { %972 = vsyncpa [#allocation3 + $0x1], 1 }
 0x5a7   :  { %973 = vsyncpa [#allocation5], 1 }
 0x5a8   :  { %975 = vsyncpa [#allocation5 + $0x1], 1 }

</bundles_post_ra>
